<compile_context>
chip_gen: v6e
topology: v6e:2x2x1
jax: 0.10.0
libtpu: 0.0.40
codegen_flags: <defaults>
</compile_context>

<pallas_src>
import jax
import jax.numpy as jnp
from jax.experimental import pallas as pl
from jax.experimental.pallas import tpu as pltpu


def _round_up(x, m):
    return (x + m - 1) // m * m


def bayes_ucb_kernel(h_ref, sig_ref, mu_ref, bias_ref, out_ref):
    h = h_ref[...]                      # (TB, d)  f32, batch on sublanes
    sig = sig_ref[...]                  # (d, d)   weight_Sig (orientation irrelevant)

    # Single MXU matmul, f32 accumulate: (TB, d) @ (d, d) -> (TB, d).
    hs = jnp.dot(h, sig, preferred_element_type=jnp.float32)

    # Per-row quadratic form h_i^T Sig h_i (lane reduce over d).
    quad = jnp.sum(hs * h, axis=-1, keepdims=True)              # (TB, 1)
    std = jnp.sqrt(jnp.maximum(quad, 0.0))                      # clamp fp negatives

    # Mean head on the VPU (free filler next to the MXU): broadcast-mul + reduce.
    mu = jnp.sum(h * mu_ref[...], axis=-1, keepdims=True) + bias_ref[0]   # (TB, 1)

    # col 0 = mu, col 1 = std.
    out_ref[...] = jnp.concatenate([mu, std], axis=-1).astype(out_ref.dtype)


def bayes_ucb_forward(h, weight_mu, bias_mu, weight_Sig):
    """Pallas forward pass of BayesUCBHead. Returns (ypred_mu, ypred_std), each (B, 1)."""
    h = jnp.asarray(h, jnp.float32)
    B, d = h.shape

    # --- generation-aware VMEM budget --------------------------------------
    try:
        vmem_cap = int(pltpu.get_tpu_info().vmem_capacity_bytes)
    except Exception:
        vmem_cap = 64 * 1024 * 1024          # conservative (v7x) fallback
    budget = (vmem_cap * 3) // 4             # ~48 MiB on v7x, ~96 MiB on v5e/v6e

    # --- tile sizing: batch on sublanes, TB derived from d ------------------
    d_lanes = _round_up(d, 128)              # lane-padded width of (., d) blocks
    d_subl = _round_up(d, 8)
    target_h_tile_bytes = 2 << 20            # ~2 MiB of h per grid step
    TB = max(512, target_h_tile_bytes // (4 * d))
    B_pad = _round_up(B, 8)                  # sublane granularity only, NOT a TB multiple
    TB = min(_round_up(TB, 8), B_pad)

    # Resident cost of the constant blocks (single-buffered via pl.Buffered(1)).
    fixed_bytes = 4 * (d_subl * d_lanes + 8 * d_lanes)          # Sig + weight_mu
    # Per-batch-row cost: double-buffered h tile + double-buffered output tile.
    per_row_bytes = 4 * (2 * d_lanes + 2 * 128)
    avail = budget - fixed_bytes
    if avail > 0:
        tb_cap = (avail // per_row_bytes) // 8 * 8
        if tb_cap >= 8:
            TB = min(TB, tb_cap)
    # TODO(synk): for very large d (Sig alone exceeds the VMEM budget, ~3k on
    # v7x / ~5k on v5e-v6e) add a K grid axis over d with a small f32
    # accumulator scratch instead of shrinking TB.

    est_vmem = fixed_bytes + TB * per_row_bytes
    vmem_limit = int(min(budget, max(32 * 1024 * 1024, 2 * est_vmem)))

    # --- layout plumbing (dominant h stream stays untouched) ----------------
    h_in = h if B_pad == B else jnp.pad(h, ((0, B_pad - B), (0, 0)))
    sig = jnp.asarray(weight_Sig, jnp.float32)                  # (d, d), as-is
    mu_row = jnp.asarray(weight_mu, jnp.float32).reshape(1, d)  # (1, d)
    bias = jnp.asarray(bias_mu, jnp.float32).reshape(1)         # (1,) scalar -> SMEM

    grid = (pl.cdiv(B_pad, TB),)

    out = pl.pallas_call(
        bayes_ucb_kernel,
        out_shape=jax.ShapeDtypeStruct((B_pad, 2), jnp.float32),
        grid=grid,
        in_specs=[
            pl.BlockSpec((TB, d), lambda i: (i, 0)),             # h tile, native layout
            pl.BlockSpec((d, d), lambda i: (0, 0),
                         pipeline_mode=pl.Buffered(1)),          # Sig, DMA'd once
            pl.BlockSpec((1, d), lambda i: (0, 0),
                         pipeline_mode=pl.Buffered(1)),          # weight_mu, DMA'd once
            pl.BlockSpec(memory_space=pltpu.MemorySpace.SMEM),   # bias scalar
        ],
        out_specs=pl.BlockSpec((TB, 2), lambda i: (i, 0)),
        compiler_params=pltpu.CompilerParams(
            dimension_semantics=("parallel",),
            vmem_limit_bytes=vmem_limit,
        ),
    )(h_in, sig, mu_row, bias)

    ypred_mu = out[:B, 0:1]
    ypred_std = out[:B, 1:2]
    return ypred_mu, ypred_std


if __name__ == "__main__":
    B, D = 8, 32
    key = jax.random.PRNGKey(0)
    k_h, k_h0, k_y0 = jax.random.split(key, 3)

    h = jax.random.normal(k_h, (B, D), dtype=jnp.float32)

    # BayesUCBHead.__init__ (lambda_ = 1): Sig_inv = I, Sig = inv(I) = I, mu = 0.
    lambda_, sigma = 1.0, 1.0
    weight_Sig_inv = jnp.eye(D, dtype=jnp.float32) / lambda_
    weight_Sig = jnp.linalg.inv(weight_Sig_inv)
    weight_mu = jnp.zeros((D, 1), dtype=jnp.float32)
    bias_mu = jnp.array([0.25], dtype=jnp.float32)

    # One Bayesian update (mirrors BayesUCBHead.update_belief) so the kernel is
    # exercised with non-trivial parameters.
    h0 = jax.random.normal(k_h0, (16, D), dtype=jnp.float32)
    y0 = jax.random.normal(k_y0, (16, 1), dtype=jnp.float32)
    weight_Sig_inv_new = weight_Sig_inv + h0.T @ h0 / sigma ** 2
    weight_Sig_new = jnp.linalg.inv(weight_Sig_inv_new + 0.001 * jnp.eye(D))
    mu_prev = weight_Sig_inv @ weight_mu
    weight_mu_new = weight_Sig_new @ (mu_prev + h0.T @ (y0 - bias_mu) / sigma ** 2)
    weight_Sig, weight_mu = weight_Sig_new, weight_mu_new

    ypred_mu, ypred_std = bayes_ucb_forward(h, weight_mu, bias_mu, weight_Sig)
    jax.block_until_ready((ypred_mu, ypred_std))

    # Pure-JAX reference of BayesUCBHead.forward.
    ref_mu = h @ weight_mu + bias_mu
    ref_std = jnp.sqrt(((h @ weight_Sig) * h).sum(axis=1)).reshape(B, 1)
    assert ypred_mu.shape == (B, 1) and ypred_std.shape == (B, 1)
    assert jnp.allclose(ypred_mu, ref_mu, atol=1e-4, rtol=1e-4)
    assert jnp.allclose(ypred_std, ref_std, atol=1e-4, rtol=1e-4)

    print("KERNEL_OK")
</pallas_src>

<mosaic_0001>
module attributes {stable_mosaic.version = 11 : i64} {
  func.func @bayes_ucb_kernel(%arg0: i32, %arg1: memref<8x32xf32, #tpu.memory_space<vmem>>, %arg2: memref<32x32xf32, #tpu.memory_space<vmem>>, %arg3: memref<1x32xf32, #tpu.memory_space<vmem>>, %arg4: memref<1xf32, #tpu.memory_space<smem>>, %arg5: memref<8x2xf32, #tpu.memory_space<vmem>>) attributes {dimension_semantics = [#tpu.dimension_semantics<parallel>], iteration_bounds = array<i64: 1>, scalar_prefetch = 0 : i64, scratch_operands = 0 : i64, tpu.core_type = #tpu.core_type<tc>, window_params = [{transform_indices = @transform_0, window_bounds = array<i64: 8, 32>}, {pipeline_mode = #tpu.pipeline_mode<synchronous>, transform_indices = @transform_1, window_bounds = array<i64: 32, 32>}, {pipeline_mode = #tpu.pipeline_mode<synchronous>, transform_indices = @transform_2, window_bounds = array<i64: 1, 32>}, {transform_indices = @transform_3, window_bounds = array<i64: 1>}, {transform_indices = @transform_4, window_bounds = array<i64: 8, 2>}]} {
    %c0 = arith.constant 0 : index
    %c0_0 = arith.constant 0 : index
    %0 = vector.load %arg1[%c0, %c0_0] : memref<8x32xf32, #tpu.memory_space<vmem>>, vector<8x32xf32>
    %c0_1 = arith.constant 0 : index
    %c0_2 = arith.constant 0 : index
    %1 = vector.load %arg2[%c0_1, %c0_2] : memref<32x32xf32, #tpu.memory_space<vmem>>, vector<32x32xf32>
    %cst = arith.constant dense<0.000000e+00> : vector<8x32xf32>
    %2 = tpu.matmul %0, %1, %cst {dimension_numbers = #tpu.dot_dimension_numbers<[1], [0], [0], [1], [0, 0, 1, 1], [], []>} : vector<8x32xf32>, vector<32x32xf32>, vector<8x32xf32> -> vector<8x32xf32>
    %3 = arith.mulf %2, %0 : vector<8x32xf32>
    %cst_3 = arith.constant dense<0.000000e+00> : vector<8xf32>
    %4 = vector.multi_reduction <add>, %3, %cst_3 [1] : vector<8x32xf32> to vector<8xf32>
    %5 = vector.shape_cast %4 : vector<8xf32> to vector<8x1xf32>
    %cst_4 = arith.constant 0.000000e+00 : f32
    %6 = vector.broadcast %cst_4 : f32 to vector<8x1xf32>
    %7 = arith.maximumf %5, %6 : vector<8x1xf32>
    %8 = math.sqrt %7 : vector<8x1xf32>
    %c0_5 = arith.constant 0 : index
    %c0_6 = arith.constant 0 : index
    %9 = vector.load %arg3[%c0_5, %c0_6] : memref<1x32xf32, #tpu.memory_space<vmem>>, vector<1x32xf32>
    %10 = vector.broadcast %9 : vector<1x32xf32> to vector<8x32xf32>
    %11 = arith.mulf %0, %10 : vector<8x32xf32>
    %cst_7 = arith.constant dense<0.000000e+00> : vector<8xf32>
    %12 = vector.multi_reduction <add>, %11, %cst_7 [1] : vector<8x32xf32> to vector<8xf32>
    %13 = vector.shape_cast %12 : vector<8xf32> to vector<8x1xf32>
    %c0_8 = arith.constant 0 : index
    %14 = memref.load %arg4[%c0_8] : memref<1xf32, #tpu.memory_space<smem>>
    %15 = vector.broadcast %14 : f32 to vector<8x1xf32>
    %16 = arith.addf %13, %15 : vector<8x1xf32>
    %17 = tpu.concatenate %16, %8 in 1 : vector<8x1xf32>, vector<8x1xf32> -> vector<8x2xf32>
    %c0_9 = arith.constant 0 : index
    %c0_10 = arith.constant 0 : index
    %18 = vector.load %arg5[%c0_9, %c0_10] : memref<8x2xf32, #tpu.memory_space<vmem>>, vector<8x2xf32>
    tpu.vector_store %arg5[%c0_9, %c0_10], %17 {strides = array<i32>} : memref<8x2xf32, #tpu.memory_space<vmem>>, vector<8x2xf32>,
    return
  }
  func.func @transform_0(%arg0: i32) -> (i32, i32) {
    %c0_i32 = arith.constant 0 : i32
    %c0_i32_0 = arith.constant 0 : i32
    return %arg0, %c0_i32 : i32, i32
  }
  func.func @transform_1(%arg0: i32) -> (i32, i32) {
    %c0_i32 = arith.constant 0 : i32
    %c0_i32_0 = arith.constant 0 : i32
    %c0_i32_1 = arith.constant 0 : i32
    return %c0_i32, %c0_i32_0 : i32, i32
  }
  func.func @transform_2(%arg0: i32) -> (i32, i32) {
    %c0_i32 = arith.constant 0 : i32
    %c0_i32_0 = arith.constant 0 : i32
    %c0_i32_1 = arith.constant 0 : i32
    return %c0_i32, %c0_i32_0 : i32, i32
  }
  func.func @transform_3(%arg0: i32) -> i32 {
    %c0_i32 = arith.constant 0 : i32
    %c0_i32_0 = arith.constant 0 : i32
    return %c0_i32 : i32
  }
  func.func @transform_4(%arg0: i32) -> (i32, i32) {
    %c0_i32 = arith.constant 0 : i32
    %c0_i32_0 = arith.constant 0 : i32
    return %arg0, %c0_i32 : i32, i32
  }
}

</mosaic_0001>

<bundles_post_ra>
// kernel: tpu_custom_call.1
= control target key start
LH: loop header
LB: loop body
LE: loop exit
PB: predicated region body
PF: predicated region fallthrough
CT: control target
= control target key end

     0   :  { %10 = vsyncpa [#allocation4], 0  ;;  %s275_s0 = inlined_call_operand.hbm [shape: f32[8,32], index: 0, kind: input, shape index: {}]   ;;  %s276_s1 = inlined_call_operand.hbm [shape: f32[32,32], index: 1, kind: input, shape index: {}]   ;;  %s277_s2 = inlined_call_operand.vmem [shape: f32[1,32], index: 2, kind: input, shape index: {}]   ;;  %s278_s3 = inlined_call_operand.<no memory space> [shape: f32[1], index: 3, kind: input, shape index: {}]   ;;  %s279_s4 = inlined_call_operand.vmem [shape: f32[8,2], index: 4, kind: output, shape index: {}]  }
   0x1   :  { %11 = vsyncpa [#allocation6], 0  ;;  %s229_s15 = smov [#allocation3]   ;;  %s230_s17 = smov [#allocation5]  }
   0x2   :  { %s18_s16 = sshll.u32 %s229_s15, 4  ;;  %s27_s18 = sshll.u32 %s230_s17, 4  ;;  %s19_s16 = int_to_ptr.vmem [resolvable:$true] %s18_s16  ;;  %s28_s18 = int_to_ptr.vmem [resolvable:$true] %s27_s18 }
   0x3   :  { %s193_s19 = scalar_lea.vmem %s19_s16, 128  ;;  %p198_p1 = scmp.lt.s32.totalorder %s19_s16, %s19_s16 }
   0x4   :  { %p194_p0 = scmp.ne.s32.totalorder %s19_s16, %s193_s19  ;;  %p199_p2 = scmp.lt.s32.totalorder %s193_s19, %s193_s19 }
   0x6   :  { %p200_p3 = por %p199_p2, %p198_p1 }
   0x8   :  { %p201_p4 = pnand %p200_p3, %p194_p0 }
   0xa   :  { %204 = shalt.err (!%p201_p4)
}
   0xb   :  { %21 = dma.hbm_to_vmem [thread:$0]  %s275_s0, 128, %s19_s16, [#allocation4]  }
   0xc   :  { %s213_s22 = scalar_lea.vmem %s28_s18, 512  ;;  %p218_p6 = scmp.lt.s32.totalorder %s28_s18, %s28_s18 }
   0xd   :  { %p214_p5 = scmp.ne.s32.totalorder %s28_s18, %s213_s22  ;;  %p219_p7 = scmp.lt.s32.totalorder %s213_s22, %s213_s22 }
   0xf   :  { %p220_p8 = por %p219_p7, %p218_p6 }
  0x11   :  { %p221_p9 = pnand %p220_p8, %p214_p5 }
  0x13   :  { %224 = shalt.err (!%p221_p9)
}
  0x14   :  { %s231_s23 = smov 128   ;;  %s232_s24 = smov 8  }
  0x15   :  { %33 = dma.hbm_to_vmem [thread:$0]  %s276_s1, 512, %s28_s18, [#allocation6], %s231_s23, %s231_s23, %s232_s24  }
  0x16   :  { %225 = dma.done.wait [#allocation4], 128  }
  0x17   :  { %226 = vsyncadd [#allocation4], 4294967168 }
  0x18   :  { %227 = dma.done.wait [#allocation6], 512  }
  0x19   :  { %228 = vsyncadd [#allocation6], 4294966784  ;;  %v233_v0 = vmov 0.0   ;;  %vm234_vm0 = vmmov 0   ;;  %v48_v1 = vld [vmem:[#allocation5 + $0x18] sm:$0xff]  ;;  %v47_v2 = vld [vmem:[#allocation5 + $0x10] sm:$0xff]  ;;  %v147_v15 = vstv %s278_s3 }
  0x1a   :  { %166 = vmatprep.subr.mxu0 %v233_v0  ;;  %174 = vmatprep.mubr.msk.f32.mxu0 %vm234_vm0, %v233_v0  ;;  %v46_v3 = vld [vmem:[#allocation5 + $0x8] sm:$0xff]  ;;  %v45_v4 = vld [vmem:[#allocation5] sm:$0xff]  ;;  %v44_v5 = vld [vmem:[#allocation3] sm:$0xff]  ;;  %vm49_vm1 = vcmask 261120   ;;  %vm149_vm3 = vcmask 7168   ;;  %vm151_vm5 = vcmask 15360  }
  0x1b   :  { %167 = vmatpush3.msra.mxu0 %v48_v1  ;;  %v160_v6 = vld [vmem:[%s277_s2] ss:$0 sm:$0xff] }
  0x1c   :  { %168 = vmatprep.subr.mxu0 %v233_v0  ;;  %v142_v9 = vmul.f32 %v160_v6, %v44_v5 }
  0x1d   :  { %169 = vmatpush3.msra.mxu0 %v47_v2 }
  0x1e   :  { %170 = vmatprep.subr.mxu0 %v233_v0  ;;  %v143_v12 = vsel %vm49_vm1, %v142_v9, 0.0 }
  0x1f   :  { %171 = vmatpush3.msra.mxu0 %v46_v3 }
  0x20   :  { %172 = vmatprep.subr.mxu0 %v233_v0 }
  0x21   :  { %173 = vmatpush3.msra.mxu0 %v45_v4 }
  0x22   :  { %175 = vmatmul.mubr.msk.f32.vlgmr.msra.gmra.mxu0 %vm49_vm1, %v44_v5 }
  0xe2   :  { %v119_v7 = vpop.f32.mrf.mxu0 }
  0xe3   :  { %v123_v8 = vmul.f32 %v119_v7, %v44_v5 }
  0xe4   :  { %v176_v10 = vpop.f32.mrf.mxu0 }
  0xe5   :  { %v124_v11 = vsel %vm49_vm1, %v123_v8, 0.0 }
  0xe6   :  { %125 = vadd.xlane.f32.xlu0 %v124_v11 }
  0xea   :  { %144 = vadd.xlane.f32.xlu0 %v143_v12 }
 0x16f   :  { %v126_v13 = vpop.xlane.xlu0 %125 }
 0x170   :  { %v127_v14 = vmax.f32 %v126_v13, 0.0 }
 0x172   :  { %183 = vrsqrt.f32 %v127_v14  ;;  %vm130_vm2 = vcmp.eq.f32.partialorder %v127_v14, inf  ;;  %v133_v20 = vand.u32 2147483648, %v127_v14  ;;  %vm132_vm4 = vcmp.eq.f32.partialorder %v127_v14, 0.0 }
 0x173   :  { %v145_v16 = vpop.xlane.xlu0 %144 }
 0x174   :  { %v148_v19 = vadd.f32 %v147_v15, %v145_v16 }
 0x17f   :  { %v184_v17 = vpop.eup %183 }
 0x180   :  { %v129_v18 = vmul.f32 %v184_v17, %v127_v14 }
 0x182   :  { %v131_v21 = vsel %vm130_vm2, %v127_v14, %v129_v18 }
 0x183   :  { %v134_v22 = vsel %vm132_vm4, %v133_v20, %v131_v21 }
 0x184   :  { %v150_v23 = vsel %vm149_vm3, %v148_v19, %v134_v22 }
 0x185   :  { %152 = vst.msk [vmem:[%s279_s4] sm:$0xff] %vm151_vm5, %v150_v23 }
 0x186   :  { %157 = vsyncpa [#allocation4], 1 }
 0x187   :  { %158 = vsyncpa [#allocation6], 1 }

</bundles_post_ra>
